<compile_context>
chip_gen: v6e
topology: v6e:2x2x1
jax: 0.10.0
libtpu: 0.0.40
codegen_flags: <defaults>
</compile_context>

<pallas_src>
from functools import partial

import numpy as np

import jax
import jax.numpy as jnp
from jax import lax
from jax.experimental import pallas as pl
from jax.experimental.pallas import tpu as pltpu


_LANE = 128
_SUB = 8
_BF16_SUB = 16          # sublane pack factor for bf16
_TILE_B_CAP = 256       # bag rows per grid step; 256-wide MXU (v6e/v7x). Use 128 on v5e.


def _round_up(x, m):
    return (x + m - 1) // m * m


def _embedbag_fc_kernel(starts_ref, ends_ref, tok_ref, wt_ref, bias_ref, out_ref):
    # starts_ref/ends_ref : VMEM (TILE_B, 1) int32   bag boundaries (global token idx)
    # tok_ref             : VMEM (T_pad, D_pad) bf16 pre-gathered token embeddings
    # wt_ref              : VMEM (D_pad, C_pad) bf16 fc weight, transposed + padded
    # bias_ref            : VMEM (1, C_pad) f32
    # out_ref             : VMEM (TILE_B, C_pad) f32 (lane-dense)
    tile_b = starts_ref.shape[0]
    t_pad = tok_ref.shape[0]

    starts = starts_ref[...]                                   # (TILE_B, 1)
    ends = ends_ref[...]                                       # (TILE_B, 1)
    counts = (ends - starts).astype(jnp.float32)
    # Exact divide (strict parity with the f32 mean); empty/padded bags -> 0 rows.
    inv_counts = 1.0 / jnp.maximum(counts, 1.0)                # (TILE_B, 1)

    # Bag membership of every token for this tile of bags, with 1/count folded in.
    tok_idx = lax.broadcasted_iota(jnp.int32, (tile_b, t_pad), 1)
    member = ((tok_idx >= starts) & (tok_idx < ends)).astype(jnp.float32)
    member = (member * inv_counts).astype(jnp.bfloat16)        # (TILE_B, T_pad)

    # Per-bag means directly: (TILE_B, D_pad), f32 accumulation on the MXU.
    means = jnp.dot(member, tok_ref[...], preferred_element_type=jnp.float32)

    # Fused Linear: (TILE_B, C_pad), single lane-dense store.
    logits = jnp.dot(means.astype(jnp.bfloat16), wt_ref[...],
                     preferred_element_type=jnp.float32) + bias_ref[...]
    out_ref[...] = logits.astype(out_ref.dtype)


def prepare_params(emb_w, fc_w, fc_b):
    """One-time padding / transpose / bf16 cast of the model parameters.

    Kept OUT of the per-call forward so no full-table HBM copy is paid per call.
    """
    vocab, embed_dim = emb_w.shape
    num_class = fc_w.shape[0]
    d_pad = _round_up(embed_dim, _LANE)
    c_pad = _round_up(num_class, _LANE)
    emb_p = jnp.zeros((vocab, d_pad), jnp.bfloat16).at[:, :embed_dim].set(
        emb_w.astype(jnp.bfloat16))
    wt_p = jnp.zeros((d_pad, c_pad), jnp.bfloat16).at[:embed_dim, :num_class].set(
        fc_w.astype(jnp.bfloat16).T)
    bias_p = jnp.zeros((1, c_pad), jnp.float32).at[0, :num_class].set(
        fc_b.astype(jnp.float32))
    return emb_p, wt_p, bias_p


@partial(jax.jit, static_argnames=("num_class",))
def text_classifier_forward(text, offsets, emb_p, wt_p, bias_p, *, num_class):
    """EmbeddingBag(mode='mean') + Linear, fused into one Pallas TPU kernel."""
    T = text.shape[0]
    B = offsets.shape[0]
    d_pad = emb_p.shape[1]
    c_pad = wt_p.shape[1]

    # Per-call token-embedding gather in XLA: O(T*D), independent of vocab size.
    t_pad = _round_up(max(T, 1), _BF16_SUB)
    tok_emb = jnp.zeros((t_pad, d_pad), jnp.bfloat16).at[:T].set(
        jnp.take(emb_p, text.astype(jnp.int32), axis=0))

    # Bag tiling: amortize per-step overhead, and guarantee >= 2 grid steps so a
    # v7x megacore can shard the "parallel" bag axis across both TensorCores.
    if B <= 2 * _TILE_B_CAP:
        tile_b = max(_SUB, _round_up(pl.cdiv(B, 2), _SUB))
    else:
        tile_b = _TILE_B_CAP
    b_pad = max(_round_up(B, tile_b), 2 * tile_b)
    grid_b = b_pad // tile_b

    off = offsets.astype(jnp.int32)
    ends_v = jnp.concatenate([off[1:], jnp.array([T], jnp.int32)])
    # Padded bags get start == end == T  ->  count 0  ->  zero embedding.
    starts = jnp.full((b_pad, 1), T, jnp.int32).at[:B, 0].set(off)
    ends = jnp.full((b_pad, 1), T, jnp.int32).at[:B, 0].set(ends_v)

    flops = 2 * b_pad * (t_pad * d_pad + d_pad * c_pad)
    bytes_accessed = (2 * tok_emb.size + 2 * wt_p.size + 4 * bias_p.size
                      + 4 * (starts.size + ends.size) + 4 * b_pad * c_pad)

    out = pl.pallas_call(
        _embedbag_fc_kernel,
        out_shape=jax.ShapeDtypeStruct((b_pad, c_pad), jnp.float32),
        grid=(grid_b,),
        in_specs=[
            pl.BlockSpec((tile_b, 1), lambda b: (b, 0)),       # bag starts
            pl.BlockSpec((tile_b, 1), lambda b: (b, 0)),       # bag ends
            pl.BlockSpec((t_pad, d_pad), lambda b: (0, 0)),    # token embeddings (bf16)
            pl.BlockSpec((d_pad, c_pad), lambda b: (0, 0)),    # fc weight^T (bf16)
            pl.BlockSpec((1, c_pad), lambda b: (0, 0)),        # fc bias (f32)
        ],
        out_specs=pl.BlockSpec((tile_b, c_pad), lambda b: (b, 0)),
        compiler_params=pltpu.CompilerParams(
            dimension_semantics=("parallel",),   # bags independent -> 2 TCs on v7x
            # Resident footprint after the gather restructure is tiny; 48 MiB stays
            # under v7x's 64 MiB physical VMEM and is ample headroom on v5e/v6e.
            vmem_limit_bytes=48 * 1024 * 1024),
        cost_estimate=pl.CostEstimate(flops=flops, transcendentals=0,
                                      bytes_accessed=bytes_accessed),
    )(starts, ends, tok_emb, wt_p, bias_p)

    return out[:B, :num_class]


def _reference(text, offsets, emb_w, fc_w, fc_b):
    """NumPy float64 reference matching nn.EmbeddingBag(mean) + nn.Linear."""
    text = np.asarray(text)
    offsets = np.asarray(offsets)
    emb_w = np.asarray(emb_w, np.float64)
    fc_w = np.asarray(fc_w, np.float64)
    fc_b = np.asarray(fc_b, np.float64)
    T = text.shape[0]
    B = offsets.shape[0]
    off_ext = np.concatenate([offsets, [T]])
    bags = []
    for b in range(B):
        s, e = int(off_ext[b]), int(off_ext[b + 1])
        bag = (emb_w[text[s:e]].mean(axis=0) if e > s
               else np.zeros(emb_w.shape[1]))
        bags.append(bag)
    emb = np.stack(bags)                           # (B, embed_dim)
    return emb @ fc_w.T + fc_b


if __name__ == "__main__":
    # Small synthetic shapes consistent with the module (exercise padding paths).
    vocab_size, embed_dim, num_class = 100, 64, 4
    key = jax.random.PRNGKey(0)
    k_emb, k_fc, k_txt = jax.random.split(key, 3)

    # init_weights(): uniform(-0.5, 0.5) weights, zero bias.
    initrange = 0.5
    emb_w = jax.random.uniform(k_emb, (vocab_size, embed_dim),
                               jnp.float32, -initrange, initrange)
    fc_w = jax.random.uniform(k_fc, (num_class, embed_dim),
                              jnp.float32, -initrange, initrange)
    fc_b = jnp.zeros((num_class,), jnp.float32)

    # Batch of 4 variable-length "sentences" flattened into one token stream.
    total_tokens = 20
    text = jax.random.randint(k_txt, (total_tokens,), 0, vocab_size, jnp.int32)
    offsets = jnp.array([0, 5, 9, 15], jnp.int32)   # batch = 4

    # One-time parameter preparation (padding / transpose / bf16 cast).
    emb_p, wt_p, bias_p = prepare_params(emb_w, fc_w, fc_b)

    logits = text_classifier_forward(text, offsets, emb_p, wt_p, bias_p,
                                     num_class=num_class)
    jax.block_until_ready(logits)

    ref = _reference(text, offsets, emb_w, fc_w, fc_b)
    assert logits.shape == (offsets.shape[0], num_class), logits.shape
    # Tolerance reflects bf16 MXU operands (f32 accumulation); well within margin.
    assert np.allclose(np.asarray(logits), ref, atol=2e-2, rtol=2e-2), (
        np.asarray(logits), ref)

    print("KERNEL_OK")
</pallas_src>

<mosaic_0001>
module attributes {stable_mosaic.version = 11 : i64} {
  func.func @_embedbag_fc_kernel(%arg0: i32, %arg1: memref<8x1xi32, #tpu.memory_space<vmem>>, %arg2: memref<8x1xi32, #tpu.memory_space<vmem>>, %arg3: memref<32x128xbf16, #tpu.memory_space<vmem>>, %arg4: memref<128x128xbf16, #tpu.memory_space<vmem>>, %arg5: memref<1x128xf32, #tpu.memory_space<vmem>>, %arg6: memref<8x128xf32, #tpu.memory_space<vmem>>) attributes {dimension_semantics = [#tpu.dimension_semantics<parallel>], iteration_bounds = array<i64: 2>, scalar_prefetch = 0 : i64, scratch_operands = 0 : i64, tpu.core_type = #tpu.core_type<tc>, window_params = [{transform_indices = @transform_0, window_bounds = array<i64: 8, 1>}, {transform_indices = @transform_1, window_bounds = array<i64: 8, 1>}, {pipeline_mode = #tpu.pipeline_mode<synchronous>, transform_indices = @transform_2, window_bounds = array<i64: 32, 128>}, {pipeline_mode = #tpu.pipeline_mode<synchronous>, transform_indices = @transform_3, window_bounds = array<i64: 128, 128>}, {pipeline_mode = #tpu.pipeline_mode<synchronous>, transform_indices = @transform_4, window_bounds = array<i64: 1, 128>}, {transform_indices = @transform_5, window_bounds = array<i64: 8, 128>}]} {
    %c0 = arith.constant 0 : index
    %c0_0 = arith.constant 0 : index
    %0 = vector.load %arg1[%c0, %c0_0] : memref<8x1xi32, #tpu.memory_space<vmem>>, vector<8x1xi32>
    %c0_1 = arith.constant 0 : index
    %c0_2 = arith.constant 0 : index
    %1 = vector.load %arg2[%c0_1, %c0_2] : memref<8x1xi32, #tpu.memory_space<vmem>>, vector<8x1xi32>
    %2 = arith.subi %1, %0 : vector<8x1xi32>
    %3 = arith.sitofp %2 : vector<8x1xi32> to vector<8x1xf32>
    %cst = arith.constant 1.000000e+00 : f32
    %4 = vector.broadcast %cst : f32 to vector<8x1xf32>
    %5 = arith.maximumf %3, %4 : vector<8x1xf32>
    %cst_3 = arith.constant 1.000000e+00 : f32
    %6 = vector.broadcast %cst_3 : f32 to vector<8x1xf32>
    %7 = arith.divf %6, %5 : vector<8x1xf32>
    %8 = tpu.iota {dimensions = array<i32: 1>} : vector<8x32xi32>
    %9 = vector.broadcast %0 : vector<8x1xi32> to vector<8x32xi32>
    %10 = arith.cmpi sge, %8, %9 : vector<8x32xi32>
    %11 = vector.broadcast %1 : vector<8x1xi32> to vector<8x32xi32>
    %12 = arith.cmpi slt, %8, %11 : vector<8x32xi32>
    %13 = arith.andi %10, %12 : vector<8x32xi1>
    %14 = arith.extui %13 : vector<8x32xi1> to vector<8x32xi32>
    %15 = arith.sitofp %14 : vector<8x32xi32> to vector<8x32xf32>
    %16 = vector.broadcast %7 : vector<8x1xf32> to vector<8x32xf32>
    %17 = arith.mulf %15, %16 : vector<8x32xf32>
    %18 = arith.truncf %17 : vector<8x32xf32> to vector<8x32xbf16>
    %c0_4 = arith.constant 0 : index
    %c0_5 = arith.constant 0 : index
    %19 = vector.load %arg3[%c0_4, %c0_5] : memref<32x128xbf16, #tpu.memory_space<vmem>>, vector<32x128xbf16>
    %cst_6 = arith.constant dense<0.000000e+00> : vector<8x128xf32>
    %20 = tpu.matmul %18, %19, %cst_6 {dimension_numbers = #tpu.dot_dimension_numbers<[1], [0], [0], [1], [0, 0, 1, 1], [], []>} : vector<8x32xbf16>, vector<32x128xbf16>, vector<8x128xf32> -> vector<8x128xf32>
    %21 = arith.truncf %20 : vector<8x128xf32> to vector<8x128xbf16>
    %c0_7 = arith.constant 0 : index
    %c0_8 = arith.constant 0 : index
    %22 = vector.load %arg4[%c0_7, %c0_8] : memref<128x128xbf16, #tpu.memory_space<vmem>>, vector<128x128xbf16>
    %cst_9 = arith.constant dense<0.000000e+00> : vector<8x128xf32>
    %23 = tpu.matmul %21, %22, %cst_9 {dimension_numbers = #tpu.dot_dimension_numbers<[1], [0], [0], [1], [0, 0, 1, 1], [], []>} : vector<8x128xbf16>, vector<128x128xbf16>, vector<8x128xf32> -> vector<8x128xf32>
    %c0_10 = arith.constant 0 : index
    %c0_11 = arith.constant 0 : index
    %24 = vector.load %arg5[%c0_10, %c0_11] : memref<1x128xf32, #tpu.memory_space<vmem>>, vector<1x128xf32>
    %25 = vector.broadcast %24 : vector<1x128xf32> to vector<8x128xf32>
    %26 = arith.addf %23, %25 : vector<8x128xf32>
    %c0_12 = arith.constant 0 : index
    %c0_13 = arith.constant 0 : index
    %27 = vector.load %arg6[%c0_12, %c0_13] : memref<8x128xf32, #tpu.memory_space<vmem>>, vector<8x128xf32>
    tpu.vector_store %arg6[%c0_12, %c0_13], %26 {strides = array<i32>} : memref<8x128xf32, #tpu.memory_space<vmem>>, vector<8x128xf32>,
    return
  }
  func.func @transform_0(%arg0: i32) -> (i32, i32) {
    %c0_i32 = arith.constant 0 : i32
    %c0_i32_0 = arith.constant 0 : i32
    return %arg0, %c0_i32 : i32, i32
  }
  func.func @transform_1(%arg0: i32) -> (i32, i32) {
    %c0_i32 = arith.constant 0 : i32
    %c0_i32_0 = arith.constant 0 : i32
    return %arg0, %c0_i32 : i32, i32
  }
  func.func @transform_2(%arg0: i32) -> (i32, i32) {
    %c0_i32 = arith.constant 0 : i32
    %c0_i32_0 = arith.constant 0 : i32
    %c0_i32_1 = arith.constant 0 : i32
    return %c0_i32, %c0_i32_0 : i32, i32
  }
  func.func @transform_3(%arg0: i32) -> (i32, i32) {
    %c0_i32 = arith.constant 0 : i32
    %c0_i32_0 = arith.constant 0 : i32
    %c0_i32_1 = arith.constant 0 : i32
    return %c0_i32, %c0_i32_0 : i32, i32
  }
  func.func @transform_4(%arg0: i32) -> (i32, i32) {
    %c0_i32 = arith.constant 0 : i32
    %c0_i32_0 = arith.constant 0 : i32
    %c0_i32_1 = arith.constant 0 : i32
    return %c0_i32, %c0_i32_0 : i32, i32
  }
  func.func @transform_5(%arg0: i32) -> (i32, i32) {
    %c0_i32 = arith.constant 0 : i32
    %c0_i32_0 = arith.constant 0 : i32
    return %arg0, %c0_i32 : i32, i32
  }
}

</mosaic_0001>

<bundles_post_ra>
// kernel: text_classifier_forward.1
= control target key start
LH: loop header
LB: loop body
LE: loop exit
PB: predicated region body
PF: predicated region fallthrough
CT: control target
= control target key end

     0   :  { %s632_s18 = smov 0   ;;  %s690_s0 = inlined_call_operand.vmem [shape: s32[16,1], index: 0, kind: input, shape index: {}]   ;;  %s691_s1 = inlined_call_operand.vmem [shape: s32[16,1], index: 1, kind: input, shape index: {}]   ;;  %s692_s2 = inlined_call_operand.vmem [shape: bf16[32,128], index: 2, kind: input, shape index: {}]   ;;  %s693_s3 = inlined_call_operand.vmem [shape: bf16[128,128], index: 3, kind: input, shape index: {}]   ;;  %s694_s4 = inlined_call_operand.vmem [shape: f32[1,128], index: 4, kind: input, shape index: {}]   ;;  %s695_s5 = inlined_call_operand.vmem [shape: f32[16,128], index: 5, kind: output, shape index: {}]  }
   0x1 LB: > { %s503_s19 = sadd.s32 4294967295, %s597_s18   ;;  %p507_p0 = scmp.ge.s32.totalorder %s597_s18, 1  ;;  %s597_s18 = sphi %s632_s18, %s15_s18  }
   0x2   : > { %p195_p1 = scmp.lt.s32.totalorder %s597_s18, 3 }
   0x4   : > { %p196_p2 = pnand %p507_p0, %p195_p1 }
   0x5   : > { %p225_p3 = scmp.lt.s32.totalorder (!%p196_p2), %s503_s19, 1 }
   0x6   : > { %199 = sbr.rel (%p196_p2) target bundleno = 558 (0x22e), region = 40 }
   0xb   : > { %v599_v0 = vmov 0   ;;  %s697_s19 = smov (!%p225_p3, %s503_s19), 1  ;;  %v579_v4 = vld [vmem:[%s692_s2 + $0x8] sm:$0xff]   ;;  %v600_v6 = vmov 0.0   ;;  %v580_v8 = vld [vmem:[%s692_s2] sm:$0xff]   ;;  %vm601_vm0 = vmmov 0   ;;  %v245_v18 = vlaneseq }
   0xc   : > { %577 = vset.pattern.permute.xlu0 %v599_v0  ;;  %578 = vset.pattern.permute.xlu1 %v599_v0  ;;  %s640_s20 = sshll.u32 %s697_s19, 3  ;;  %v581_v10 = vld [vmem:[%s693_s3 + $0x38] sm:$0xff]   ;;  %v582_v11 = vld [vmem:[%s693_s3 + $0x30] sm:$0xff]   ;;  %v583_v12 = vld [vmem:[%s693_s3 + $0x28] sm:$0xff]   ;;  %vm281_vm4 = vcmask 261120  }
   0xd   : > { %s228_s23 = scalar_lea.vmem %s690_s0, %s640_s20  ;;  %s232_s26 = scalar_lea.vmem %s691_s1, %s640_s20  ;;  %538 = vmatprep.subr.bf16.mxu0 %v600_v6  ;;  %546 = vmatprep.subr.bf16.mxu1 %v600_v6  ;;  %v584_v13 = vld [vmem:[%s693_s3 + $0x20] sm:$0xff]   ;;  %v585_v14 = vld [vmem:[%s693_s3 + $0x18] sm:$0xff]   ;;  %v586_v15 = vld [vmem:[%s693_s3 + $0x10] sm:$0xff]   ;;  %v246_v19 = vand.u32 127, %v245_v18 }
   0xe   : > { %v238_v1 = vld [vmem:[%s228_s23] sm:$0xff]  ;;  %539 = vmatpush3.bf16.msra.mxu0 %v579_v4  ;;  %542 = vmatprep.mubr.msk.bf16.mxu0 %vm601_vm0, %v600_v6  ;;  %v587_v16 = vld [vmem:[%s693_s3 + $0x8] sm:$0xff]   ;;  %s236_s28 = scalar_lea.vmem %s695_s5, %s640_s20 }
   0xf   : > { %v239_v2 = vld [vmem:[%s232_s26] sm:$0xff]  ;;  %248 = vperm.xlu0 %577, %v238_v1   ;;  %540 = vmatprep.subr.bf16.mxu0 %v600_v6 }
  0x10   : > { %v240_v3 = vsub.s32 %v239_v2, %v238_v1  ;;  %562 = vmatprep.mubr.msk.bf16.mxu1 %vm601_vm0, %v600_v6  ;;  %547 = vmatpush3.bf16.msra.mxu1 %v581_v10  ;;  %v588_v25 = vld [vmem:[%s693_s3] sm:$0xff]  }
  0x11   : > { %548 = vmatprep.subr.bf16.mxu1 %v600_v6  ;;  %v515_v31 = vld [vmem:[%s694_s4] ss:$0 sm:$0xff] }
  0x12   : > { %v241_v5 = vcvt.s32.f32 %v240_v3  ;;  %541 = vmatpush3.bf16.msra.mxu0 %v580_v8 }
  0x13   : > { %252 = vperm.xlu0 %577, %v239_v2  }
  0x14   : > { %v242_v7 = vmax.f32 %v241_v5, 1.0  ;;  %549 = vmatpush3.bf16.msra.mxu1 %v582_v11 }
  0x15   : > { %550 = vmatprep.subr.bf16.mxu1 %v600_v6 }
  0x16   : > { %589 = vrcp.f32 %v242_v7 }
  0x18   : > { %551 = vmatpush3.bf16.msra.mxu1 %v583_v12 }
  0x19   : > { %552 = vmatprep.subr.bf16.mxu1 %v600_v6 }
  0x1c   : > { %553 = vmatpush3.bf16.msra.mxu1 %v584_v13 }
  0x1d   : > { %554 = vmatprep.subr.bf16.mxu1 %v600_v6 }
  0x20   : > { %555 = vmatpush3.bf16.msra.mxu1 %v585_v14 }
  0x21   : > { %556 = vmatprep.subr.bf16.mxu1 %v600_v6 }
  0x23   : > { %v590_v9 = vpop.eup %589 }
  0x24   : > { %260 = vperm.xlu1 %578, %v590_v9   ;;  %557 = vmatpush3.bf16.msra.mxu1 %v586_v15 }
  0x25   : > { %558 = vmatprep.subr.bf16.mxu1 %v600_v6 }
  0x28   : > { %559 = vmatpush3.bf16.msra.mxu1 %v587_v16 }
  0x29   : > { %560 = vmatprep.subr.bf16.mxu1 %v600_v6 }
  0x2c   : > { %561 = vmatpush3.bf16.msra.mxu1 %v588_v25 }
  0x8a   : > { %v249_v17 = vpop.permute.xlu0 %248 }
  0x8b   : > { %vm250_vm1 = vcmp.ge.s32.totalorder %v246_v19, %v249_v17 }
  0x8e   : > { %v253_v20 = vpop.permute.xlu0 %252 }
  0x8f   : > { %vm254_vm2 = vcmp.lt.s32.totalorder %v246_v19, %v253_v20 }
  0x90   : > { %vm255_vm3 = vmand %vm250_vm1, %vm254_vm2 }
  0x91   : > { %v511_v21 = vsel %vm255_vm3, 1.0, %v600_v6 }
  0x9f   : > { %v261_v22 = vpop.permute.xlu1 %260 }
  0xa0   : > { %v263_v23 = vmul.f32 %v511_v21, %v261_v22 }
  0xa2   : > { %v264_v24 = vpack.c.bf16 %v263_v23, %v263_v23 }
  0xa4   : > { %543 = vmatmul.mubr.msk.bf16.vlgmr.msra.gmra.mxu0 %vm281_vm4, %v264_v24 }
 0x164   : > { %v319_v26 = vpop.f32.mrf.mxu0 }
 0x165   : > { %v325_v27 = vpack.c.bf16 %v319_v26, %v319_v26 }
 0x166   : > { %v544_v28 = vpop.f32.mrf.mxu0 }
 0x167   : > { %563 = vmatmul.mubr.bf16.vlgmr.msra.gmra.mxu1 %v325_v27 }
 0x168   : > { %v322_v29 = vpop.f32.mrf.mxu0 }
 0x16a   : > { %v545_v30 = vpop.f32.mrf.mxu0 }
 0x227   : > { %v431_v32 = vpop.f32.mrf.mxu1 }
 0x228   : > { %v432_v33 = vadd.f32 %v515_v31, %v431_v32 }
 0x229   : > { %v564_v34 = vpop.f32.mrf.mxu1 }
 0x22a   : > { %437 = vst [vmem:[%s236_s28] sm:$0xff] %v432_v33 }
 0x22b   : > { %v434_v35 = vpop.f32.mrf.mxu1 }
 0x22d   : > { %v565_v36 = vpop.f32.mrf.mxu1 }
 0x22e PF: > { %s15_s18 = sadd.s32 1, %s597_s18  }
 0x22f   : > { %p12_p4 = scmp.ge.s32.totalorder %s15_s18, 4  }
 0x231   :  { %14 = sbr.rel (!%p12_p4) target bundleno = 1 (0x1), region = 73 }

</bundles_post_ra>
